<compile_context>
chip_gen: v7x
topology: tpu7x:2x2x1
jax: 0.10.0
libtpu: 0.0.40
codegen_flags: <defaults>
</compile_context>

<pallas_src>
import functools

import jax
import jax.numpy as jnp
from jax import lax
from jax.experimental import pallas as pl
from jax.experimental.pallas import tpu as pltpu

LANES = 128     # vreg lane width
SUBLANES = 8    # vreg sublane count


def _round_up(n, m):
    return ((n + m - 1) // m) * m


def _log_slice_cat_kernel(x_ref, out_ref, *, hi_w, mask_col, hi_start, lo_start):
    """out[:, i] = log(x[:, hi_start + i])            for i in [0, hi_w)
       out[:, i] = log(x[:, lo_start + i])            for i in [hi_w, out_w)
       lanes >= out_w are junk (finite) and sliced off in the wrapper."""
    x = x_ref[...]                                               # (TB, in_w) f32
    col = lax.broadcasted_iota(jnp.int32, x.shape, 1)
    # Only columns >= mask_col can reach the output; mask the rest to 1.0 so log stays finite
    # everywhere (avoids NaN/Inf lanes from columns 0..24 / padding).
    xl = jnp.log(jnp.where(col >= mask_col, x, 1.0))             # EUP, one pass

    out_pad = out_ref.shape[1]                                   # multiple of 128
    hi = xl[:, hi_start:hi_start + out_pad]                      # lane-shifted window: cols 30+i
    lo = xl[:, lo_start:lo_start + out_pad]                      # lane-shifted window: cols 25+(i-hi_w)
    lane = lax.broadcasted_iota(jnp.int32, hi.shape, 1)
    out_ref[...] = jnp.where(lane < hi_w, hi, lo)                # single lane-dense store


def mlp_forward(x, params=None, num_classes=None, *, block_rows=1024):
    """Pallas equivalent of MultiLayerPerceptron.forward.

    `params` / `num_classes` are accepted for API parity with the PyTorch module, but the MLP
    output `y` is discarded by the original forward, so the dead matmul chain is skipped and the
    kernel only computes the returned log/slice/concat value.
    """
    del params, num_classes  # dead in the PyTorch forward (y is never used)

    B, F = x.shape
    if F <= 30:
        raise ValueError(f"input_dims must be > 30 for this forward to be well-defined; got {F}")

    out_w = F - 25                      # final output width
    hi_w = out_w - 5                    # width of the log(x[:, 30:]) part
    out_pad = _round_up(out_w, LANES)   # lane-dense (multiple of 128) output slab
    front = max(0, out_w - 30)          # front padding so both lane windows start >= 0
    in_w = front + 30 + out_pad         # padded input width (covers both windows)

    tb = min(block_rows, _round_up(B, SUBLANES))   # 8-row-aligned batch tile
    b_pad = _round_up(B, tb)

    # Layout plumbing only: 8-row-aligned batch, lane-padded columns; pad value 1.0 keeps log
    # finite on padded rows/columns.
    x_pad = jnp.pad(
        x.astype(jnp.float32),
        ((0, b_pad - B), (front, in_w - front - F)),
        constant_values=1.0,
    )

    kernel = functools.partial(
        _log_slice_cat_kernel,
        hi_w=hi_w,
        mask_col=front + 25,
        hi_start=front + 30,
        lo_start=front + 30 - out_w,
    )

    out_padded = pl.pallas_call(
        kernel,
        grid=(b_pad // tb,),
        in_specs=[pl.BlockSpec((tb, in_w), lambda i: (i, 0))],
        out_specs=pl.BlockSpec((tb, out_pad), lambda i: (i, 0)),
        out_shape=jax.ShapeDtypeStruct((b_pad, out_pad), jnp.float32),
        compiler_params=pltpu.CompilerParams(
            dimension_semantics=("parallel",),        # shard batch tiles across TCs (v7x)
            vmem_limit_bytes=32 * 1024 * 1024,        # explicit, safe on v5e/v6e/v7x
        ),
    )(x_pad)

    return out_padded[:B, :out_w]


if __name__ == "__main__":
    key = jax.random.PRNGKey(0)

    B = 2
    input_dims = 48            # must be > 30 for the forward's slicing to make sense
    num_classes = 8
    layer_params = (64, 32, 32)
    channels = [input_dims] + list(layer_params) + [num_classes]

    keys = jax.random.split(key, 2 * (len(channels) - 1) + 1)

    # positive inputs so torch.log is well defined
    x = jax.random.uniform(keys[0], (B, input_dims), jnp.float32, minval=0.5, maxval=2.0)

    # nn.Linear-shaped parameters (stored transposed).  They exist for API parity with the
    # PyTorch module, but the forward discards y = mlp(x), so the kernel never touches them.
    params = []
    for i in range(len(channels) - 1):
        fan_in = channels[i]
        bound = 1.0 / (fan_in ** 0.5)
        w = jax.random.uniform(keys[2 * i + 1], (channels[i], channels[i + 1]),
                               jnp.float32, minval=-bound, maxval=bound)
        b = jax.random.uniform(keys[2 * i + 2], (1, channels[i + 1]),
                               jnp.float32, minval=-bound, maxval=bound)
        params.append((w, b))

    out = jax.block_until_ready(mlp_forward(x, params, num_classes))

    # pure-JAX reference of the PyTorch forward semantics
    xs = jnp.log(x[:, 2:])
    ref = jnp.concatenate([xs[:, 28:], xs[:, 23:28]], axis=1)
    assert out.shape == ref.shape, (out.shape, ref.shape)
    assert bool(jnp.allclose(out, ref, atol=1e-6)), "mismatch vs reference"

    print("KERNEL_OK")
</pallas_src>

<mosaic_0001>
module attributes {stable_mosaic.version = 11 : i64} {
  func.func @_log_slice_cat_kernel(%arg0: i32, %arg1: memref<8x158xf32, #tpu.memory_space<vmem>>, %arg2: memref<8x128xf32, #tpu.memory_space<vmem>>) attributes {dimension_semantics = [#tpu.dimension_semantics<parallel>], iteration_bounds = array<i64: 1>, scalar_prefetch = 0 : i64, scratch_operands = 0 : i64, tpu.core_type = #tpu.core_type<tc>, window_params = [{transform_indices = @transform_0, window_bounds = array<i64: 8, 158>}, {transform_indices = @transform_1, window_bounds = array<i64: 8, 128>}]} {
    %c0 = arith.constant 0 : index
    %c0_0 = arith.constant 0 : index
    %0 = vector.load %arg1[%c0, %c0_0] : memref<8x158xf32, #tpu.memory_space<vmem>>, vector<8x158xf32>
    %1 = tpu.iota {dimensions = array<i32: 1>} : vector<8x158xi32>
    %c25_i32 = arith.constant 25 : i32
    %2 = vector.broadcast %c25_i32 : i32 to vector<8x158xi32>
    %3 = arith.cmpi sge, %1, %2 : vector<8x158xi32>
    %cst = arith.constant 1.000000e+00 : f32
    %4 = vector.broadcast %cst : f32 to vector<8x158xf32>
    %5 = arith.select %3, %0, %4 : vector<8x158xi1>, vector<8x158xf32>
    %6 = math.log %5 : vector<8x158xf32>
    %7 = vector.extract_strided_slice %6 {offsets = [0, 30], sizes = [8, 128], strides = [1, 1]} : vector<8x158xf32> to vector<8x128xf32>
    %8 = vector.extract_strided_slice %6 {offsets = [0, 7], sizes = [8, 128], strides = [1, 1]} : vector<8x158xf32> to vector<8x128xf32>
    %9 = tpu.iota {dimensions = array<i32: 1>} : vector<8x128xi32>
    %c18_i32 = arith.constant 18 : i32
    %10 = vector.broadcast %c18_i32 : i32 to vector<8x128xi32>
    %11 = arith.cmpi slt, %9, %10 : vector<8x128xi32>
    %12 = arith.select %11, %7, %8 : vector<8x128xi1>, vector<8x128xf32>
    %c0_1 = arith.constant 0 : index
    %c0_2 = arith.constant 0 : index
    %13 = vector.load %arg2[%c0_1, %c0_2] : memref<8x128xf32, #tpu.memory_space<vmem>>, vector<8x128xf32>
    tpu.vector_store %arg2[%c0_1, %c0_2], %12 {strides = array<i32>} : memref<8x128xf32, #tpu.memory_space<vmem>>, vector<8x128xf32>,
    return
  }
  func.func @transform_0(%arg0: i32) -> (i32, i32) {
    %c0_i32 = arith.constant 0 : i32
    %c0_i32_0 = arith.constant 0 : i32
    return %arg0, %c0_i32 : i32, i32
  }
  func.func @transform_1(%arg0: i32) -> (i32, i32) {
    %c0_i32 = arith.constant 0 : i32
    %c0_i32_0 = arith.constant 0 : i32
    return %arg0, %c0_i32 : i32, i32
  }
}

</mosaic_0001>

<bundles_post_ra>
// kernel: tpu_custom_call.1
= control target key start
LH: loop header
LB: loop body
LE: loop exit
PB: predicated region body
PF: predicated region fallthrough
CT: control target
= control target key end

     0   :  { %6 = vsyncpa [#allocation3], 0  ;;  %s162_s0 = inlined_call_operand.hbm [shape: f32[8,158], index: 0, kind: input, shape index: {}]   ;;  %s163_s1 = inlined_call_operand.hbm [shape: f32[8,128], index: 1, kind: output, shape index: {}]  }
   0x1   :  { %7 = vsyncpa [#allocation4], 0  ;;  %s124_s6 = smov [#allocation2]   ;;  %s76_s10 = scalar_lea.hbm %s162_s0, 256 }
   0x2   :  { %s14_s7 = sshll.u32 %s124_s6, 4  ;;  %p77_p0 = scmp.ne.s32.totalorder %s162_s0, %s76_s10  ;;  %s15_s7 = int_to_ptr.vmem [resolvable:$true] %s14_s7 }
   0x3   :  { %p80_p1 = scmp.lt.u32.totalorder %s76_s10, %s162_s0 }
   0x5   :  { %p82_p2 = pnand %p80_p1, %p77_p0 }
   0x7   :  { %85 = shalt.err (!%p82_p2)
}
   0x8   :  { %s86_s15 = scalar_lea.vmem %s15_s7, 256  ;;  %p91_p4 = scmp.lt.s32.totalorder %s15_s7, %s15_s7 }
   0x9   :  { %p87_p3 = scmp.ne.s32.totalorder %s15_s7, %s86_s15  ;;  %p92_p5 = scmp.lt.s32.totalorder %s86_s15, %s86_s15 }
   0xb   :  { %p93_p6 = por %p92_p5, %p91_p4 }
   0xd   :  { %p94_p7 = pnand %p93_p6, %p87_p3 }
   0xf   :  { %97 = shalt.err (!%p94_p7)
}
  0x10   :  { %17 = dma.hbm_to_vmem [thread:$0]  %s162_s0, 256, %s15_s7, [#allocation3]  }
  0x11   :  { %120 = dma.done.wait [#allocation3], 256  }
  0x12   :  { %121 = vsyncadd [#allocation3], 4294967040  ;;  %v23_v0 = vlaneseq  ;;  %v21_v2 = vld [vmem:[#allocation2] sm:$0xff]  ;;  %v22_v3 = vld [vmem:[#allocation2 + $0x8] sm:$0xff]  ;;  %s125_s18 = smov 121   ;;  %s126_s19 = smov 98  }
  0x13   :  { %72 = vlog2.f32 %v22_v3  ;;  %vm48_vm1 = vcmask 990208   ;;  %vm41_vm2 = vcmask 801792   ;;  %s127_s0 = smov [#allocation5]  }
  0x14   :  { %v24_v1 = vand.u32 127, %v23_v0  ;;  %s59_s20 = sshll.u32 %s127_s0, 4  ;;  %s60_s20 = int_to_ptr.vmem [resolvable:$true] %s59_s20 }
  0x15   :  { %s98_s21 = scalar_lea.vmem %s60_s20, 128  ;;  %p103_p9 = scmp.lt.s32.totalorder %s60_s20, %s60_s20 }
  0x16   :  { %vm26_vm0 = vcmp.ge.s32.totalorder %v24_v1, 25  ;;  %vm34_vm3 = vcmp.lt.s32.totalorder %v24_v1, 18  ;;  %p99_p8 = scmp.ne.s32.totalorder %s60_s20, %s98_s21  ;;  %p104_p10 = scmp.lt.s32.totalorder %s98_s21, %s98_s21 }
  0x17   :  { %v28_v4 = vsel %vm26_vm0, %v21_v2, 1.0 }
  0x18   :  { %74 = vlog2.f32 %v28_v4  ;;  %p105_p11 = por %p104_p10, %p103_p9 }
  0x1a   :  { %p106_p12 = pnand %p105_p11, %p99_p8 }
  0x1d   :  { %v73_v5 = vpop.eup %72 }
  0x1e   :  { %v33_v8 = vmul.f32 0.6931472, %v73_v5 }
  0x22   :  { %v75_v6 = vpop.eup %74 }
  0x23   :  { %v31_v7 = vmul.f32 0.6931472, %v75_v6 }
  0x25   :  { %44 = vrot.lane.b32.xlu1 %v31_v7, %s125_s18  ;;  %37 = vrot.lane.b32.xlu0 %v31_v7, %s126_s19 }
  0x29   :  { %46 = vrot.lane.b32.xlu1 %v33_v8, %s125_s18  ;;  %39 = vrot.lane.b32.xlu0 %v33_v8, %s126_s19 }
  0x97   :  { %v45_v9 = vpop.permute.xlu1 %44  ;;  %v38_v10 = vpop.permute.xlu0 %37 }
  0x9b   :  { %v47_v11 = vpop.permute.xlu1 %46  ;;  %v40_v12 = vpop.permute.xlu0 %39 }
  0x9c   :  { %v49_v13 = vsel %vm48_vm1, %v45_v9, %v47_v11  ;;  %v42_v14 = vsel %vm41_vm2, %v38_v10, %v40_v12 }
  0x9d   :  { %v51_v15 = vsel %vm34_vm3, %v42_v14, %v49_v13 }
  0x9e   :  { %52 = vst [vmem:[#allocation5] sm:$0xff] %v51_v15 }
  0x9f   :  { %109 = shalt.err (!%p106_p12)
}
  0xa0   :  { %s110_s24 = scalar_lea.hbm %s163_s1, 128 }
  0xa1   :  { %p111_p13 = scmp.ne.s32.totalorder %s163_s1, %s110_s24  ;;  %p114_p0 = scmp.lt.u32.totalorder %s110_s24, %s163_s1 }
  0xa3   :  { %p116_p1 = pnand %p114_p0, %p111_p13 }
  0xa5   :  { %119 = shalt.err (!%p116_p1)
}
  0xa6   :  { %62 = dma.vmem_to_hbm [thread:$0]  %s60_s20, 128, %s163_s1, [#allocation4]  }
  0xa7   :  { %122 = dma.done.wait [#allocation4], 128  }
  0xa8   :  { %123 = vsyncadd [#allocation4], 4294967168 }
  0xa9   :  { %66 = vsyncpa [#allocation3], 1 }
  0xaa   :  { %67 = vsyncpa [#allocation4], 1 }

</bundles_post_ra>
